<compile_context>
chip_gen: v7x
topology: tpu7x:2x2x1
jax: 0.10.0
libtpu: 0.0.40
codegen_flags: <defaults>
</compile_context>

<pallas_src>
import jax
import jax.numpy as jnp
from jax.experimental import pallas as pl
from jax.experimental.pallas import tpu as pltpu


def _round_up(x, m):
    return ((x + m - 1) // m) * m


def _reasoner_kernel(x_ref, wj_ref, bj_ref, wn_ref, bn_ref, wf_ref, bf_ref,
                     out_ref):
    x = x_ref[...]                                            # (TB, K) bf16

    # JointLayer('cat'): one fused Linear(K -> H) + tanh, f32 accumulation.
    z = jnp.tanh(
        jnp.dot(x, wj_ref[...], preferred_element_type=jnp.float32)
        + bj_ref[...])

    # net: Linear(H -> H) + relu.
    h = jnp.maximum(
        jnp.dot(z.astype(jnp.bfloat16), wn_ref[...],
                preferred_element_type=jnp.float32) + bn_ref[...],
        0.0)

    # final: relu -> Linear(H -> L) -> sigmoid.  h >= 0 already, so the extra
    # relu is a no-op and is elided (saves a full-tile VPU pass).
    logits = jnp.dot(h.astype(jnp.bfloat16), wf_ref[...],
                     preferred_element_type=jnp.float32) + bf_ref[...]
    out_ref[...] = jax.nn.sigmoid(logits)


def _vmem_budget_bytes(tb, k, h, l):
    # bf16 weights (default pipeline double-buffers them) + f32 biases.
    w = 2 * 2 * (k * h + h * h + h * l)
    b = 2 * 4 * (2 * h + l)
    # double-buffered bf16 input tile + f32 output tile.
    act = 2 * tb * k * 2 + 2 * tb * l * 4
    # f32 intermediates (z, h, logits).
    inter = 3 * tb * h * 4
    return w + b + act + inter


def reasoner_forward(obs, explain, params, *, tile_b=256):
    """obs: [B, obs_size], explain: [B, explain_size] -> [B, label_size]."""
    B, obs_size = obs.shape
    explain_size = explain.shape[1]
    hidden_size = params["wn"].shape[0]
    label_size = params["wf"].shape[1]

    # ---- pad everything to TPU-friendly (8, 128) multiples -----------------
    k = obs_size + explain_size
    k_pad = _round_up(k, 128)
    h_pad = _round_up(hidden_size, 128)
    l_pad = _round_up(label_size, 128)          # lane-dense output store

    tb = min(_round_up(tile_b, 8), _round_up(B, 8))
    while tb > 8 and _vmem_budget_bytes(tb, k_pad, h_pad, l_pad) > (40 << 20):
        tb //= 2
    b_pad = _round_up(B, tb)

    # Fused joint input: concat([obs, explain], -1), zero-padded, bf16.
    x = jnp.concatenate([obs, explain], axis=-1)
    x = jnp.pad(x, ((0, b_pad - B), (0, k_pad - k))).astype(jnp.bfloat16)

    # Fused joint weight: stack Wj_obs / Wj_exp -> a single (K, H) matmul
    # (mathematically identical to concat-then-multiply).
    wj = jnp.concatenate([params["wj_obs"], params["wj_exp"]], axis=0)
    wj = jnp.pad(wj, ((0, k_pad - k), (0, h_pad - hidden_size))).astype(jnp.bfloat16)
    bj = jnp.pad(params["bj"], ((0, 0), (0, h_pad - hidden_size))).astype(jnp.float32)
    wn = jnp.pad(params["wn"],
                 ((0, h_pad - hidden_size), (0, h_pad - hidden_size))).astype(jnp.bfloat16)
    bn = jnp.pad(params["bn"], ((0, 0), (0, h_pad - hidden_size))).astype(jnp.float32)
    wf = jnp.pad(params["wf"],
                 ((0, h_pad - hidden_size), (0, l_pad - label_size))).astype(jnp.bfloat16)
    bf = jnp.pad(params["bf"], ((0, 0), (0, l_pad - label_size))).astype(jnp.float32)

    grid = (b_pad // tb,)
    vmem_limit = int(min(max(_vmem_budget_bytes(tb, k_pad, h_pad, l_pad) + (4 << 20),
                             16 << 20),
                         48 << 20))

    out_pad = pl.pallas_call(
        _reasoner_kernel,
        out_shape=jax.ShapeDtypeStruct((b_pad, l_pad), jnp.float32),
        grid_spec=pltpu.PrefetchScalarGridSpec(
            num_scalar_prefetch=0,
            grid=grid,
            in_specs=[
                pl.BlockSpec((tb, k_pad), lambda i: (i, 0)),      # x batch tile
                pl.BlockSpec((k_pad, h_pad), lambda i: (0, 0)),   # Wj (resident)
                pl.BlockSpec((1, h_pad), lambda i: (0, 0)),       # bj (resident)
                pl.BlockSpec((h_pad, h_pad), lambda i: (0, 0)),   # Wn (resident)
                pl.BlockSpec((1, h_pad), lambda i: (0, 0)),       # bn (resident)
                pl.BlockSpec((h_pad, l_pad), lambda i: (0, 0)),   # Wf (resident)
                pl.BlockSpec((1, l_pad), lambda i: (0, 0)),       # bf (resident)
            ],
            out_specs=pl.BlockSpec((tb, l_pad), lambda i: (i, 0)),
        ),
        compiler_params=pltpu.CompilerParams(
            dimension_semantics=("parallel",),   # megacore sharding on v7x
            vmem_limit_bytes=vmem_limit,
        ),
    )(x, wj, bj, wn, bn, wf, bf)

    return out_pad[:B, :label_size]


def make_params(key, obs_size, explain_size, hidden_size, label_size):
    ks = jax.random.split(key, 8)
    scale = 0.1
    return {
        "wj_obs": scale * jax.random.normal(ks[0], (obs_size, hidden_size), jnp.float32),
        "wj_exp": scale * jax.random.normal(ks[1], (explain_size, hidden_size), jnp.float32),
        "bj":     scale * jax.random.normal(ks[2], (1, hidden_size), jnp.float32),
        "wn":     scale * jax.random.normal(ks[3], (hidden_size, hidden_size), jnp.float32),
        "bn":     scale * jax.random.normal(ks[4], (1, hidden_size), jnp.float32),
        "wf":     scale * jax.random.normal(ks[5], (hidden_size, label_size), jnp.float32),
        "bf":     scale * jax.random.normal(ks[6], (1, label_size), jnp.float32),
    }


def reasoner_reference(obs, explain, p):
    """Pure-JAX f32 reference of the original module's forward."""
    z = jnp.tanh(jnp.concatenate([obs, explain], -1)
                 @ jnp.concatenate([p["wj_obs"], p["wj_exp"]], 0) + p["bj"])
    h = jnp.maximum(z @ p["wn"] + p["bn"], 0.0)
    y = jnp.maximum(h, 0.0)
    return jax.nn.sigmoid(y @ p["wf"] + p["bf"])


if __name__ == "__main__":
    B, OBS, EXPL, HID, LABEL = 8, 16, 8, 32, 4

    key = jax.random.PRNGKey(0)
    k_obs, k_exp, k_par = jax.random.split(key, 3)
    obs = jax.random.normal(k_obs, (B, OBS), jnp.float32)
    explain = jax.random.normal(k_exp, (B, EXPL), jnp.float32)
    params = make_params(k_par, OBS, EXPL, HID, LABEL)

    out = reasoner_forward(obs, explain, params)
    out = jax.block_until_ready(out)

    ref = reasoner_reference(obs, explain, params)
    assert out.shape == (B, LABEL)
    # bf16 matmul inputs with f32 accumulation -> small quantization error.
    assert jnp.allclose(out, ref, atol=2e-2, rtol=2e-2)

    print("KERNEL_OK")
</pallas_src>

<mosaic_0001>
module attributes {stable_mosaic.version = 11 : i64} {
  func.func @_reasoner_kernel(%arg0: i32, %arg1: memref<8x128xbf16, #tpu.memory_space<vmem>>, %arg2: memref<128x128xbf16, #tpu.memory_space<vmem>>, %arg3: memref<1x128xf32, #tpu.memory_space<vmem>>, %arg4: memref<128x128xbf16, #tpu.memory_space<vmem>>, %arg5: memref<1x128xf32, #tpu.memory_space<vmem>>, %arg6: memref<128x128xbf16, #tpu.memory_space<vmem>>, %arg7: memref<1x128xf32, #tpu.memory_space<vmem>>, %arg8: memref<8x128xf32, #tpu.memory_space<vmem>>) attributes {dimension_semantics = [#tpu.dimension_semantics<parallel>], iteration_bounds = array<i64: 1>, scalar_prefetch = 0 : i64, scratch_operands = 0 : i64, tpu.core_type = #tpu.core_type<tc>, window_params = [{transform_indices = @transform_0, window_bounds = array<i64: 8, 128>}, {pipeline_mode = #tpu.pipeline_mode<synchronous>, transform_indices = @transform_1, window_bounds = array<i64: 128, 128>}, {pipeline_mode = #tpu.pipeline_mode<synchronous>, transform_indices = @transform_2, window_bounds = array<i64: 1, 128>}, {pipeline_mode = #tpu.pipeline_mode<synchronous>, transform_indices = @transform_3, window_bounds = array<i64: 128, 128>}, {pipeline_mode = #tpu.pipeline_mode<synchronous>, transform_indices = @transform_4, window_bounds = array<i64: 1, 128>}, {pipeline_mode = #tpu.pipeline_mode<synchronous>, transform_indices = @transform_5, window_bounds = array<i64: 128, 128>}, {pipeline_mode = #tpu.pipeline_mode<synchronous>, transform_indices = @transform_6, window_bounds = array<i64: 1, 128>}, {transform_indices = @transform_7, window_bounds = array<i64: 8, 128>}]} {
    %c0 = arith.constant 0 : index
    %c0_0 = arith.constant 0 : index
    %0 = vector.load %arg1[%c0, %c0_0] : memref<8x128xbf16, #tpu.memory_space<vmem>>, vector<8x128xbf16>
    %c0_1 = arith.constant 0 : index
    %c0_2 = arith.constant 0 : index
    %1 = vector.load %arg2[%c0_1, %c0_2] : memref<128x128xbf16, #tpu.memory_space<vmem>>, vector<128x128xbf16>
    %cst = arith.constant dense<0.000000e+00> : vector<8x128xf32>
    %2 = tpu.matmul %0, %1, %cst {dimension_numbers = #tpu.dot_dimension_numbers<[1], [0], [0], [1], [0, 0, 1, 1], [], []>} : vector<8x128xbf16>, vector<128x128xbf16>, vector<8x128xf32> -> vector<8x128xf32>
    %c0_3 = arith.constant 0 : index
    %c0_4 = arith.constant 0 : index
    %3 = vector.load %arg3[%c0_3, %c0_4] : memref<1x128xf32, #tpu.memory_space<vmem>>, vector<1x128xf32>
    %4 = vector.broadcast %3 : vector<1x128xf32> to vector<8x128xf32>
    %5 = arith.addf %2, %4 : vector<8x128xf32>
    %6 = math.tanh %5 : vector<8x128xf32>
    %7 = arith.truncf %6 : vector<8x128xf32> to vector<8x128xbf16>
    %c0_5 = arith.constant 0 : index
    %c0_6 = arith.constant 0 : index
    %8 = vector.load %arg4[%c0_5, %c0_6] : memref<128x128xbf16, #tpu.memory_space<vmem>>, vector<128x128xbf16>
    %cst_7 = arith.constant dense<0.000000e+00> : vector<8x128xf32>
    %9 = tpu.matmul %7, %8, %cst_7 {dimension_numbers = #tpu.dot_dimension_numbers<[1], [0], [0], [1], [0, 0, 1, 1], [], []>} : vector<8x128xbf16>, vector<128x128xbf16>, vector<8x128xf32> -> vector<8x128xf32>
    %c0_8 = arith.constant 0 : index
    %c0_9 = arith.constant 0 : index
    %10 = vector.load %arg5[%c0_8, %c0_9] : memref<1x128xf32, #tpu.memory_space<vmem>>, vector<1x128xf32>
    %11 = vector.broadcast %10 : vector<1x128xf32> to vector<8x128xf32>
    %12 = arith.addf %9, %11 : vector<8x128xf32>
    %cst_10 = arith.constant 0.000000e+00 : f32
    %13 = vector.broadcast %cst_10 : f32 to vector<8x128xf32>
    %14 = arith.maximumf %12, %13 : vector<8x128xf32>
    %15 = arith.truncf %14 : vector<8x128xf32> to vector<8x128xbf16>
    %c0_11 = arith.constant 0 : index
    %c0_12 = arith.constant 0 : index
    %16 = vector.load %arg6[%c0_11, %c0_12] : memref<128x128xbf16, #tpu.memory_space<vmem>>, vector<128x128xbf16>
    %cst_13 = arith.constant dense<0.000000e+00> : vector<8x128xf32>
    %17 = tpu.matmul %15, %16, %cst_13 {dimension_numbers = #tpu.dot_dimension_numbers<[1], [0], [0], [1], [0, 0, 1, 1], [], []>} : vector<8x128xbf16>, vector<128x128xbf16>, vector<8x128xf32> -> vector<8x128xf32>
    %c0_14 = arith.constant 0 : index
    %c0_15 = arith.constant 0 : index
    %18 = vector.load %arg7[%c0_14, %c0_15] : memref<1x128xf32, #tpu.memory_space<vmem>>, vector<1x128xf32>
    %19 = vector.broadcast %18 : vector<1x128xf32> to vector<8x128xf32>
    %20 = arith.addf %17, %19 : vector<8x128xf32>
    %21 = arith.negf %20 : vector<8x128xf32>
    %22 = math.exp %21 : vector<8x128xf32>
    %cst_16 = arith.constant 1.000000e+00 : f32
    %23 = vector.broadcast %cst_16 : f32 to vector<8x128xf32>
    %24 = arith.addf %23, %22 : vector<8x128xf32>
    %25 = arith.divf %23, %24 : vector<8x128xf32>
    %c0_17 = arith.constant 0 : index
    %c0_18 = arith.constant 0 : index
    %26 = vector.load %arg8[%c0_17, %c0_18] : memref<8x128xf32, #tpu.memory_space<vmem>>, vector<8x128xf32>
    tpu.vector_store %arg8[%c0_17, %c0_18], %25 {strides = array<i32>} : memref<8x128xf32, #tpu.memory_space<vmem>>, vector<8x128xf32>,
    return
  }
  func.func @transform_0(%arg0: i32) -> (i32, i32) {
    %c0_i32 = arith.constant 0 : i32
    %c0_i32_0 = arith.constant 0 : i32
    return %arg0, %c0_i32 : i32, i32
  }
  func.func @transform_1(%arg0: i32) -> (i32, i32) {
    %c0_i32 = arith.constant 0 : i32
    %c0_i32_0 = arith.constant 0 : i32
    %c0_i32_1 = arith.constant 0 : i32
    return %c0_i32, %c0_i32_0 : i32, i32
  }
  func.func @transform_2(%arg0: i32) -> (i32, i32) {
    %c0_i32 = arith.constant 0 : i32
    %c0_i32_0 = arith.constant 0 : i32
    %c0_i32_1 = arith.constant 0 : i32
    return %c0_i32, %c0_i32_0 : i32, i32
  }
  func.func @transform_3(%arg0: i32) -> (i32, i32) {
    %c0_i32 = arith.constant 0 : i32
    %c0_i32_0 = arith.constant 0 : i32
    %c0_i32_1 = arith.constant 0 : i32
    return %c0_i32, %c0_i32_0 : i32, i32
  }
  func.func @transform_4(%arg0: i32) -> (i32, i32) {
    %c0_i32 = arith.constant 0 : i32
    %c0_i32_0 = arith.constant 0 : i32
    %c0_i32_1 = arith.constant 0 : i32
    return %c0_i32, %c0_i32_0 : i32, i32
  }
  func.func @transform_5(%arg0: i32) -> (i32, i32) {
    %c0_i32 = arith.constant 0 : i32
    %c0_i32_0 = arith.constant 0 : i32
    %c0_i32_1 = arith.constant 0 : i32
    return %c0_i32, %c0_i32_0 : i32, i32
  }
  func.func @transform_6(%arg0: i32) -> (i32, i32) {
    %c0_i32 = arith.constant 0 : i32
    %c0_i32_0 = arith.constant 0 : i32
    %c0_i32_1 = arith.constant 0 : i32
    return %c0_i32, %c0_i32_0 : i32, i32
  }
  func.func @transform_7(%arg0: i32) -> (i32, i32) {
    %c0_i32 = arith.constant 0 : i32
    %c0_i32_0 = arith.constant 0 : i32
    return %arg0, %c0_i32 : i32, i32
  }
}

</mosaic_0001>

<bundles_post_ra>
// kernel: tpu_custom_call.1
= control target key start
LH: loop header
LB: loop body
LE: loop exit
PB: predicated region body
PF: predicated region fallthrough
CT: control target
= control target key end

     0   :  { %12 = vsyncpa [#allocation3], 0  ;;  %s872_s0 = inlined_call_operand.hbm [shape: bf16[8,128], index: 0, kind: input, shape index: {}]   ;;  %s873_s1 = inlined_call_operand.hbm [shape: bf16[128,128], index: 1, kind: input, shape index: {}]   ;;  %s874_s2 = inlined_call_operand.vmem [shape: f32[1,128], index: 2, kind: input, shape index: {}]   ;;  %s875_s3 = inlined_call_operand.hbm [shape: bf16[128,128], index: 3, kind: input, shape index: {}]   ;;  %s876_s4 = inlined_call_operand.vmem [shape: f32[1,128], index: 4, kind: input, shape index: {}]   ;;  %s877_s5 = inlined_call_operand.hbm [shape: bf16[128,128], index: 5, kind: input, shape index: {}]   ;;  %s878_s6 = inlined_call_operand.vmem [shape: f32[1,128], index: 6, kind: input, shape index: {}]   ;;  %s879_s7 = inlined_call_operand.hbm [shape: f32[8,128], index: 7, kind: output, shape index: {}]  }
   0x1   :  { %13 = vsyncpa [#allocation6], 0 }
   0x2   :  { %14 = vsyncpa [#allocation9], 0 }
   0x3   :  { %15 = vsyncpa [#allocation4], 0  ;;  %s715_s24 = smov [#allocation5]   ;;  %s597_s28 = scalar_lea.hbm %s873_s1, 1024 }
   0x4   :  { %s31_s25 = sshll.u32 %s715_s24, 4  ;;  %p598_p0 = scmp.ne.s32.totalorder %s873_s1, %s597_s28  ;;  %s32_s25 = int_to_ptr.vmem [resolvable:$true] %s31_s25 }
   0x5   :  { %p601_p1 = scmp.lt.u32.totalorder %s597_s28, %s873_s1 }
   0x7   :  { %p603_p2 = pnand %p601_p1, %p598_p0 }
   0x9   :  { %606 = shalt.err (!%p603_p2)
}
   0xa   :  { %s607_s10 = scalar_lea.vmem %s32_s25, 1024  ;;  %p612_p4 = scmp.lt.s32.totalorder %s32_s25, %s32_s25 }
   0xb   :  { %p608_p3 = scmp.ne.s32.totalorder %s32_s25, %s607_s10  ;;  %p613_p5 = scmp.lt.s32.totalorder %s607_s10, %s607_s10 }
   0xd   :  { %p614_p6 = por %p613_p5, %p612_p4 }
   0xf   :  { %p615_p7 = pnand %p614_p6, %p608_p3 }
  0x11   :  { %618 = shalt.err (!%p615_p7)
}
  0x12   :  { %s716_s11 = smov 64   ;;  %s717_s12 = smov 4  }
  0x13   :  { %37 = dma.hbm_to_vmem [thread:$0]  %s873_s1, 1024, %s32_s25, [#allocation6], %s716_s11, %s716_s11, %s717_s12  }
  0x14   :  { %s718_s15 = smov [#allocation2]   ;;  %s719_s17 = smov [#allocation7]  }
  0x15   :  { %s22_s16 = sshll.u32 %s718_s15, 4  ;;  %s45_s18 = sshll.u32 %s719_s17, 4  ;;  %s23_s16 = int_to_ptr.vmem [resolvable:$true] %s22_s16  ;;  %s46_s18 = int_to_ptr.vmem [resolvable:$true] %s45_s18 }
  0x16   :  { %s619_s21 = scalar_lea.hbm %s872_s0, 64 }
  0x17   :  { %p620_p8 = scmp.ne.s32.totalorder %s872_s0, %s619_s21  ;;  %p623_p9 = scmp.lt.u32.totalorder %s619_s21, %s872_s0 }
  0x19   :  { %p625_p10 = pnand %p623_p9, %p620_p8 }
  0x1b   :  { %628 = shalt.err (!%p625_p10)
}
  0x1c   :  { %s629_s1 = scalar_lea.vmem %s23_s16, 64  ;;  %p634_p12 = scmp.lt.s32.totalorder %s23_s16, %s23_s16 }
  0x1d   :  { %p630_p11 = scmp.ne.s32.totalorder %s23_s16, %s629_s1  ;;  %p635_p13 = scmp.lt.s32.totalorder %s629_s1, %s629_s1 }
  0x1f   :  { %p636_p0 = por %p635_p13, %p634_p12 }
  0x21   :  { %p637_p1 = pnand %p636_p0, %p630_p11 }
  0x23   :  { %640 = shalt.err (!%p637_p1)
}
  0x24   :  { %25 = dma.hbm_to_vmem [thread:$0]  %s872_s0, 64, %s23_s16, [#allocation3]  }
  0x25   :  { %s641_s30 = scalar_lea.hbm %s875_s3, 1024 }
  0x26   :  { %p642_p2 = scmp.ne.s32.totalorder %s875_s3, %s641_s30  ;;  %p645_p3 = scmp.lt.u32.totalorder %s641_s30, %s875_s3 }
  0x28   :  { %p647_p4 = pnand %p645_p3, %p642_p2 }
  0x2a   :  { %650 = shalt.err (!%p647_p4)
}
  0x2b   :  { %s651_s14 = scalar_lea.vmem %s46_s18, 1024  ;;  %p656_p6 = scmp.lt.s32.totalorder %s46_s18, %s46_s18 }
  0x2c   :  { %p652_p5 = scmp.ne.s32.totalorder %s46_s18, %s651_s14  ;;  %p657_p7 = scmp.lt.s32.totalorder %s651_s14, %s651_s14 }
  0x2e   :  { %p658_p8 = por %p657_p7, %p656_p6 }
  0x30   :  { %p659_p9 = pnand %p658_p8, %p652_p5 }
  0x32   :  { %662 = shalt.err (!%p659_p9)
}
  0x33   :  { %51 = dma.hbm_to_vmem [thread:$0]  %s875_s3, 1024, %s46_s18, [#allocation6], %s716_s11, %s716_s11, %s717_s12  }
  0x34   :  { %s720_s16 = smov [#allocation8]   ;;  %s663_s21 = scalar_lea.hbm %s877_s5, 1024 }
  0x35   :  { %s59_s17 = sshll.u32 %s720_s16, 4  ;;  %p664_p10 = scmp.ne.s32.totalorder %s877_s5, %s663_s21  ;;  %s60_s17 = int_to_ptr.vmem [resolvable:$true] %s59_s17 }
  0x36   :  { %p667_p11 = scmp.lt.u32.totalorder %s663_s21, %s877_s5 }
  0x38   :  { %p669_p12 = pnand %p667_p11, %p664_p10 }
  0x3a   :  { %672 = shalt.err (!%p669_p12)
}
  0x3b   :  { %s673_s1 = scalar_lea.vmem %s60_s17, 1024  ;;  %p678_p0 = scmp.lt.s32.totalorder %s60_s17, %s60_s17 }
  0x3c   :  { %p674_p13 = scmp.ne.s32.totalorder %s60_s17, %s673_s1  ;;  %p679_p1 = scmp.lt.s32.totalorder %s673_s1, %s673_s1 }
  0x3e   :  { %p680_p2 = por %p679_p1, %p678_p0 }
  0x40   :  { %p681_p3 = pnand %p680_p2, %p674_p13 }
  0x42   :  { %684 = shalt.err (!%p681_p3)
}
  0x43   :  { %65 = dma.hbm_to_vmem [thread:$0]  %s877_s5, 1024, %s60_s17, [#allocation9], %s716_s11, %s716_s11, %s717_s12  }
  0x44   :  { %707 = dma.done.wait [#allocation3], 64  }
  0x45   :  { %708 = vsyncadd [#allocation3], 4294967232 }
  0x46   :  { %709 = dma.done.wait [#allocation6], 2048  }
  0x47   :  { %710 = vsyncadd [#allocation6], 4294965248 }
  0x48   :  { %711 = dma.done.wait [#allocation9], 1024  }
  0x49   :  { %712 = vsyncadd [#allocation9], 4294966272  ;;  %v721_v0 = vmov 0.0   ;;  %vm722_vm0 = vmmov 0   ;;  %v567_v1 = vld [vmem:[#allocation5] sm:$0xff]   ;;  %v568_v2 = vld [vmem:[#allocation5 + $0x8] sm:$0xff]  }
  0x4a   :  { %498 = vmatprep.subr.bf16.mxu0 %v721_v0  ;;  %514 = vmatprep.mubr.msk.bf16.mxu0 %vm722_vm0, %v721_v0  ;;  %v569_v3 = vld [vmem:[#allocation5 + $0x10] sm:$0xff]   ;;  %v575_v4 = vld [vmem:[#allocation7] sm:$0xff]   ;;  %v570_v5 = vld [vmem:[#allocation5 + $0x18] sm:$0xff]  }
  0x4b   :  { %518 = vmatprep.subr.bf16.mxu1 %v721_v0  ;;  %534 = vmatprep.mubr.msk.bf16.mxu1 %vm722_vm0, %v721_v0  ;;  %v576_v6 = vld [vmem:[#allocation7 + $0x8] sm:$0xff]   ;;  %v571_v7 = vld [vmem:[#allocation5 + $0x20] sm:$0xff]   ;;  %v577_v8 = vld [vmem:[#allocation7 + $0x10] sm:$0xff]  }
  0x4c   :  { %499 = vmatpush3.bf16.msra.mxu0 %v567_v1  ;;  %519 = vmatpush3.bf16.msra.mxu1 %v575_v4  ;;  %v572_v9 = vld [vmem:[#allocation5 + $0x28] sm:$0xff]   ;;  %v578_v10 = vld [vmem:[#allocation7 + $0x18] sm:$0xff]   ;;  %v573_v11 = vld [vmem:[#allocation5 + $0x30] sm:$0xff]  }
  0x4d   :  { %500 = vmatprep.subr.bf16.mxu0 %v721_v0  ;;  %520 = vmatprep.subr.bf16.mxu1 %v721_v0  ;;  %v574_v12 = vld [vmem:[#allocation5 + $0x38] sm:$0xff]   ;;  %v579_v14 = vld [vmem:[#allocation7 + $0x20] sm:$0xff]   ;;  %v580_v15 = vld [vmem:[#allocation7 + $0x28] sm:$0xff]  }
  0x4e   :  { %v81_v13 = vld [vmem:[#allocation2] sm:$0xf]  ;;  %v581_v16 = vld [vmem:[#allocation7 + $0x30] sm:$0xff]   ;;  %v583_v18 = vld [vmem:[#allocation8] sm:$0xff]  }
  0x4f   :  { %v582_v17 = vld [vmem:[#allocation7 + $0x38] sm:$0xff]   ;;  %v584_v19 = vld [vmem:[#allocation8 + $0x8] sm:$0xff]   ;;  %v585_v20 = vld [vmem:[#allocation8 + $0x10] sm:$0xff]  }
  0x50   :  { %501 = vmatpush3.bf16.msra.mxu0 %v568_v2  ;;  %521 = vmatpush3.bf16.msra.mxu1 %v576_v6  ;;  %v586_v21 = vld [vmem:[#allocation8 + $0x18] sm:$0xff]   ;;  %v587_v22 = vld [vmem:[#allocation8 + $0x20] sm:$0xff]   ;;  %v588_v23 = vld [vmem:[#allocation8 + $0x28] sm:$0xff]  }
  0x51   :  { %502 = vmatprep.subr.bf16.mxu0 %v721_v0  ;;  %522 = vmatprep.subr.bf16.mxu1 %v721_v0  ;;  %v443_v24 = vld [vmem:[%s874_s2] ss:$0 sm:$0xff]  ;;  %v589_v32 = vld [vmem:[#allocation8 + $0x30] sm:$0xff]  }
  0x52   :  { %v590_v33 = vld [vmem:[#allocation8 + $0x38] sm:$0xff]  }
  0x53   :  { %v452_v34 = vld [vmem:[%s876_s4] ss:$0 sm:$0xff]  ;;  %s723_s4 = smov [#allocation10]  }
  0x54   :  { %503 = vmatpush3.bf16.msra.mxu0 %v569_v3  ;;  %523 = vmatpush3.bf16.msra.mxu1 %v577_v8  ;;  %v461_v42 = vld [vmem:[%s878_s6] ss:$0 sm:$0xff]  ;;  %s432_s28 = sshll.u32 %s723_s4, 4  ;;  %s433_s28 = int_to_ptr.vmem [resolvable:$true] %s432_s28 }
  0x55   :  { %504 = vmatprep.subr.bf16.mxu0 %v721_v0  ;;  %524 = vmatprep.subr.bf16.mxu1 %v721_v0  ;;  %s685_s29 = scalar_lea.vmem %s433_s28, 128  ;;  %p690_p5 = scmp.lt.s32.totalorder %s433_s28, %s433_s28 }
  0x56   :  { %p686_p4 = scmp.ne.s32.totalorder %s433_s28, %s685_s29  ;;  %p691_p6 = scmp.lt.s32.totalorder %s685_s29, %s685_s29 }
  0x58   :  { %505 = vmatpush3.bf16.msra.mxu0 %v570_v5  ;;  %525 = vmatpush3.bf16.msra.mxu1 %v578_v10  ;;  %p692_p7 = por %p691_p6, %p690_p5 }
  0x59   :  { %506 = vmatprep.subr.bf16.mxu0 %v721_v0  ;;  %526 = vmatprep.subr.bf16.mxu1 %v721_v0 }
  0x5a   :  { %p693_p8 = pnand %p692_p7, %p686_p4 }
  0x5c   :  { %507 = vmatpush3.bf16.msra.mxu0 %v571_v7  ;;  %527 = vmatpush3.bf16.msra.mxu1 %v579_v14 }
  0x5d   :  { %508 = vmatprep.subr.bf16.mxu0 %v721_v0  ;;  %528 = vmatprep.subr.bf16.mxu1 %v721_v0 }
  0x60   :  { %509 = vmatpush3.bf16.msra.mxu0 %v572_v9  ;;  %529 = vmatpush3.bf16.msra.mxu1 %v580_v15 }
  0x61   :  { %510 = vmatprep.subr.bf16.mxu0 %v721_v0  ;;  %530 = vmatprep.subr.bf16.mxu1 %v721_v0 }
  0x64   :  { %511 = vmatpush3.bf16.msra.mxu0 %v573_v11  ;;  %531 = vmatpush3.bf16.msra.mxu1 %v581_v16 }
  0x65   :  { %512 = vmatprep.subr.bf16.mxu0 %v721_v0  ;;  %532 = vmatprep.subr.bf16.mxu1 %v721_v0 }
  0x68   :  { %513 = vmatpush3.bf16.msra.mxu0 %v574_v12  ;;  %533 = vmatpush3.bf16.msra.mxu1 %v582_v17 }
  0x69   :  { %538 = vmatprep.subr.bf16.mxu0 %v721_v0 }
  0x6b   :  { %515 = vmatmul.mubr.bf16.vlgmr.msra.gmra.mrb[0].mxu0 %v81_v13 }
  0x6c   :  { %554 = vmatprep.mubr.msk.bf16.mxu0 %vm722_vm0, %v721_v0  ;;  %539 = vmatpush3.bf16.msra.mxu0 %v583_v18 }
  0x6d   :  { %540 = vmatprep.subr.bf16.mxu0 %v721_v0 }
  0x70   :  { %541 = vmatpush3.bf16.msra.mxu0 %v584_v19 }
  0x71   :  { %542 = vmatprep.subr.bf16.mxu0 %v721_v0 }
  0x74   :  { %543 = vmatpush3.bf16.msra.mxu0 %v585_v20 }
  0x75   :  { %544 = vmatprep.subr.bf16.mxu0 %v721_v0 }
  0x78   :  { %545 = vmatpush3.bf16.msra.mxu0 %v586_v21 }
  0x79   :  { %546 = vmatprep.subr.bf16.mxu0 %v721_v0 }
  0x7c   :  { %547 = vmatpush3.bf16.msra.mxu0 %v587_v22 }
  0x7d   :  { %548 = vmatprep.subr.bf16.mxu0 %v721_v0 }
  0x80   :  { %549 = vmatpush3.bf16.msra.mxu0 %v588_v23 }
  0x81   :  { %550 = vmatprep.subr.bf16.mxu0 %v721_v0 }
  0x84   :  { %551 = vmatpush3.bf16.msra.mxu0 %v589_v32 }
  0x85   :  { %552 = vmatprep.subr.bf16.mxu0 %v721_v0 }
  0x88   :  { %553 = vmatpush3.bf16.msra.mxu0 %v590_v33 }
 0x13e   :  { %v187_v25 = vpop.f32.mrb[0].mxu0 }
 0x13f   :  { %v188_v26 = vadd.f32 %v443_v24, %v187_v25  ;;  %v516_v27 = vpop.f32.mrb[1].mxu0 }
 0x140   :  { %v190_v28 = vpop.f32.mrb[2].mxu0 }
 0x141   :  { %591 = vtanh.f32 %v188_v26  ;;  %v517_v29 = vpop.f32.mrb[3].mxu0 }
 0x14b   :  { %v592_v30 = vpop.eup %591 }
 0x14c   :  { %v194_v31 = vpack.c.bf16 %v592_v30, %v592_v30 }
 0x14e   :  { %535 = vmatmul.mubr.bf16.vlgmr.msra.gmra.mrb[0].mxu1 %v194_v31 }
 0x221   :  { %v300_v35 = vpop.f32.mrb[0].mxu1 }
 0x222   :  { %v301_v36 = vadd.f32 %v452_v34, %v300_v35  ;;  %v536_v37 = vpop.f32.mrb[1].mxu1 }
 0x223   :  { %v303_v38 = vpop.f32.mrb[2].mxu1 }
 0x224   :  { %v306_v39 = vmax.f32 %v301_v36, 0.0  ;;  %v537_v40 = vpop.f32.mrb[3].mxu1 }
 0x226   :  { %v307_v41 = vpack.c.bf16 %v306_v39, %v306_v39 }
 0x228   :  { %555 = vmatmul.mubr.bf16.vlgmr.msra.gmra.mrb[4].mxu0 %v307_v41 }
 0x2fb   :  { %v413_v43 = vpop.f32.mrb[4].mxu0 }
 0x2fc   :  { %v414_v44 = vadd.f32 %v461_v42, %v413_v43  ;;  %v556_v45 = vpop.f32.mrb[5].mxu0 }
 0x2fd   :  { %v416_v46 = vpop.f32.mrb[6].mxu0 }
 0x2fe   :  { %v470_v47 = vmul.f32 -1.442695, %v414_v44  ;;  %v557_v48 = vpop.f32.mrb[7].mxu0 }
 0x300   :  { %593 = vpow2.f32 %v470_v47 }
 0x30a   :  { %v594_v49 = vpop.eup %593 }
 0x30b   :  { %v422_v50 = vadd.f32 1.0, %v594_v49 }
 0x30d   :  { %595 = vrcp.f32 %v422_v50 }
 0x317   :  { %v596_v51 = vpop.eup %595 }
 0x318   :  { %425 = vst [vmem:[#allocation10] sm:$0xff] %v596_v51 }
 0x319   :  { %696 = shalt.err (!%p693_p8)
}
 0x31a   :  { %s697_s8 = scalar_lea.hbm %s879_s7, 128 }
 0x31b   :  { %p698_p9 = scmp.ne.s32.totalorder %s879_s7, %s697_s8  ;;  %p701_p10 = scmp.lt.u32.totalorder %s697_s8, %s879_s7 }
 0x31d   :  { %p703_p11 = pnand %p701_p10, %p698_p9 }
 0x31f   :  { %706 = shalt.err (!%p703_p11)
}
 0x320   :  { %435 = dma.vmem_to_hbm [thread:$0]  %s433_s28, 128, %s879_s7, [#allocation4]  }
 0x321   :  { %713 = dma.done.wait [#allocation4], 128  }
 0x322   :  { %714 = vsyncadd [#allocation4], 4294967168 }
 0x323   :  { %439 = vsyncpa [#allocation3], 1 }
 0x324   :  { %440 = vsyncpa [#allocation6], 1 }
 0x325   :  { %441 = vsyncpa [#allocation9], 1 }
 0x326   :  { %442 = vsyncpa [#allocation4], 1 }

</bundles_post_ra>
